<compile_context>
chip_gen: v7x
topology: tpu7x:2x2x1
jax: 0.10.0
libtpu: 0.0.40
codegen_flags: <defaults>
</compile_context>

<pallas_src>
import jax
import jax.numpy as jnp
from jax.experimental import pallas as pl
from jax.experimental.pallas import tpu as pltpu

INPUT_SIZE = 17
H1, H2, H3, OUT = 64, 128, 64, 2


def _round_up(n, m):
    return ((n + m - 1) // m) * m


def _cdiv(a, b):
    return (a + b - 1) // b


def _mlp_kernel(x_ref, w1_ref, b1_ref, w2_ref, b2_ref, w3_ref, b3_ref,
                w4d_ref, b4d_ref, o_ref):
    # Feature-major: activations are (features, TB); MXU output lanes = batch.
    x = x_ref[...].astype(jnp.bfloat16)                                # (17, TB)

    h1 = jnp.dot(w1_ref[...], x, preferred_element_type=jnp.float32) + b1_ref[...]
    h1 = jnp.maximum(h1, 0.0).astype(jnp.bfloat16)                     # (64, TB)

    # layer2 + ReLU (dropout -> identity in eval mode)
    h2 = jnp.dot(w2_ref[...], h1, preferred_element_type=jnp.float32) + b2_ref[...]
    h2 = jnp.maximum(h2, 0.0).astype(jnp.bfloat16)                     # (128, TB)

    # layer3 + ReLU (dropout -> identity in eval mode)
    h3 = jnp.dot(w3_ref[...], h2, preferred_element_type=jnp.float32) + b3_ref[...]
    h3 = jnp.maximum(h3, 0.0).astype(jnp.bfloat16)                     # (64, TB)

    # outL + softmax over 2 classes == sigmoid of the logit difference.
    d = jnp.dot(w4d_ref[...], h3, preferred_element_type=jnp.float32) + b4d_ref[...]
    p1 = pl.reciprocal(1.0 + jnp.exp(-d), approx=True)                 # (1, TB)
    o_ref[...] = p1.astype(o_ref.dtype)                                # lane-dense store


def binary_classifier_forward(x, params, *, max_tile=4096):
    """x: (B, 17) float32. Returns softmax probabilities (B, 2) float32."""
    w1, b1, w2, b2, w3, b3, w4, b4 = params
    B = x.shape[0]

    # Fold the 2-class output layer into a logit-difference (one-time XLA prep).
    w4d = (w4[:, 1] - w4[:, 0]).reshape(1, H3)          # (1, H3)  (out, in)
    b4d = (b4[:, 1] - b4[:, 0]).reshape(1, 1)           # (1, 1)

    # Feature-major (out, in) weights as bf16 MXU operands; biases f32 (out, 1).
    w1t = w1.T.astype(jnp.bfloat16)                     # (64, 17)
    w2t = w2.T.astype(jnp.bfloat16)                     # (128, 64)
    w3t = w3.T.astype(jnp.bfloat16)                     # (64, 128)
    w4dt = w4d.astype(jnp.bfloat16)                     # (1, 64)
    b1t = b1.reshape(H1, 1)
    b2t = b2.reshape(H2, 1)
    b3t = b3.reshape(H3, 1)

    # Batch tile: multiple of 256 (MXU pass height / lane-dense), never tiny,
    # capped so medium batches still produce >= 2 grid steps (v7x megacore).
    TILE = 256
    if B <= TILE:
        TB = TILE
    else:
        TB = min(max_tile, _round_up(_cdiv(B, 2), TILE))
    Bp = _round_up(B, TB)
    grid = (Bp // TB,)

    # Feature-major input slab (17, Bp); padded tail columns are zero.
    xt = (jnp.pad(x, ((0, Bp - B), (0, 0))) if Bp != B else x).T

    def resident(shape):
        # Full-array block, same block every grid step -> loaded once, stays in VMEM.
        return pl.BlockSpec(shape, lambda i: (0, 0))

    flops = 2 * Bp * (INPUT_SIZE * H1 + H1 * H2 + H2 * H3 + H3 * 1)
    param_bytes = 2 * (INPUT_SIZE * H1 + H1 * H2 + H2 * H3 + H3) \
        + 4 * (H1 + H2 + H3 + 1)
    cost = pl.CostEstimate(
        flops=flops,
        transcendentals=2 * Bp,                          # exp + approx reciprocal
        bytes_accessed=Bp * INPUT_SIZE * 4 + Bp * 4 + param_bytes,
    )

    p1 = pl.pallas_call(
        _mlp_kernel,
        out_shape=jax.ShapeDtypeStruct((1, Bp), jnp.float32),
        grid=grid,
        in_specs=[
            pl.BlockSpec((INPUT_SIZE, TB), lambda i: (0, i)),   # x: batch-blocked (lanes)
            resident((H1, INPUT_SIZE)), resident((H1, 1)),
            resident((H2, H1)), resident((H2, 1)),
            resident((H3, H2)), resident((H3, 1)),
            resident((1, H3)), resident((1, 1)),
        ],
        out_specs=pl.BlockSpec((1, TB), lambda i: (0, i)),
        compiler_params=pltpu.CompilerParams(
            dimension_semantics=("parallel",),
            vmem_limit_bytes=32 * 1024 * 1024,
        ),
        cost_estimate=cost,
    )(xt, w1t, b1t, w2t, b2t, w3t, b3t, w4dt, b4d)

    p1 = p1[0, :B]                                       # (B,)
    return jnp.stack([1.0 - p1, p1], axis=-1)            # (B, 2) softmax probs


def init_params(key):
    """Deterministic init mimicking PyTorch Linear default: U(-1/sqrt(fan_in), +)."""
    def linear(key, fan_in, fan_out):
        kw, kb = jax.random.split(key)
        bound = 1.0 / jnp.sqrt(fan_in)
        # stored as (in, out) so the reference does x @ W
        w = jax.random.uniform(kw, (fan_in, fan_out), jnp.float32, -bound, bound)
        b = jax.random.uniform(kb, (1, fan_out), jnp.float32, -bound, bound)
        return w, b

    k1, k2, k3, k4 = jax.random.split(key, 4)
    w1, b1 = linear(k1, INPUT_SIZE, H1)
    w2, b2 = linear(k2, H1, H2)
    w3, b3 = linear(k3, H2, H3)
    w4, b4 = linear(k4, H3, OUT)
    return (w1, b1, w2, b2, w3, b3, w4, b4)


def _reference(x, params):
    w1, b1, w2, b2, w3, b3, w4, b4 = params
    h1 = jnp.maximum(x @ w1 + b1, 0.0)
    h2 = jnp.maximum(h1 @ w2 + b2, 0.0)
    h3 = jnp.maximum(h2 @ w3 + b3, 0.0)
    logits = h3 @ w4 + b4
    return jax.nn.softmax(logits, axis=-1)


if __name__ == "__main__":
    key = jax.random.PRNGKey(0)
    k_x, k_p = jax.random.split(key)

    B = 8
    x = jax.random.normal(k_x, (B, INPUT_SIZE), jnp.float32)
    params = init_params(k_p)

    out = binary_classifier_forward(x, params)
    out = jax.block_until_ready(out)

    assert out.shape == (B, OUT)

    # softmax rows sum to 1 (exact by construction of [1-p, p])
    row_sums = jnp.sum(out, axis=-1)
    assert jnp.allclose(row_sums, jnp.ones_like(row_sums), atol=1e-5)

    # matches the f32 reference (bf16 matmul operands + approx recip -> loose tol)
    ref = _reference(x, params)
    assert jnp.allclose(out, ref, atol=3e-2), (out, ref)

    print("KERNEL_OK")
</pallas_src>

<mosaic_0001>
module attributes {stable_mosaic.version = 11 : i64} {
  func.func @_mlp_kernel(%arg0: i32, %arg1: memref<17x256xf32, #tpu.memory_space<vmem>>, %arg2: memref<64x17xbf16, #tpu.memory_space<vmem>>, %arg3: memref<64x1xf32, #tpu.memory_space<vmem>>, %arg4: memref<128x64xbf16, #tpu.memory_space<vmem>>, %arg5: memref<128x1xf32, #tpu.memory_space<vmem>>, %arg6: memref<64x128xbf16, #tpu.memory_space<vmem>>, %arg7: memref<64x1xf32, #tpu.memory_space<vmem>>, %arg8: memref<1x64xbf16, #tpu.memory_space<vmem>>, %arg9: memref<1x1xf32, #tpu.memory_space<vmem>>, %arg10: memref<1x256xf32, #tpu.memory_space<vmem>>) attributes {dimension_semantics = [#tpu.dimension_semantics<parallel>], iteration_bounds = array<i64: 1>, scalar_prefetch = 0 : i64, scratch_operands = 0 : i64, tpu.core_type = #tpu.core_type<tc>, window_params = [{transform_indices = @transform_0, window_bounds = array<i64: 17, 256>}, {pipeline_mode = #tpu.pipeline_mode<synchronous>, transform_indices = @transform_1, window_bounds = array<i64: 64, 17>}, {pipeline_mode = #tpu.pipeline_mode<synchronous>, transform_indices = @transform_2, window_bounds = array<i64: 64, 1>}, {pipeline_mode = #tpu.pipeline_mode<synchronous>, transform_indices = @transform_3, window_bounds = array<i64: 128, 64>}, {pipeline_mode = #tpu.pipeline_mode<synchronous>, transform_indices = @transform_4, window_bounds = array<i64: 128, 1>}, {pipeline_mode = #tpu.pipeline_mode<synchronous>, transform_indices = @transform_5, window_bounds = array<i64: 64, 128>}, {pipeline_mode = #tpu.pipeline_mode<synchronous>, transform_indices = @transform_6, window_bounds = array<i64: 64, 1>}, {pipeline_mode = #tpu.pipeline_mode<synchronous>, transform_indices = @transform_7, window_bounds = array<i64: 1, 64>}, {pipeline_mode = #tpu.pipeline_mode<synchronous>, transform_indices = @transform_8, window_bounds = array<i64: 1, 1>}, {transform_indices = @transform_9, window_bounds = array<i64: 1, 256>}]} {
    %c0 = arith.constant 0 : index
    %c0_0 = arith.constant 0 : index
    %0 = vector.load %arg1[%c0, %c0_0] : memref<17x256xf32, #tpu.memory_space<vmem>>, vector<17x256xf32>
    %1 = arith.truncf %0 : vector<17x256xf32> to vector<17x256xbf16>
    %c0_1 = arith.constant 0 : index
    %c0_2 = arith.constant 0 : index
    %2 = vector.load %arg2[%c0_1, %c0_2] : memref<64x17xbf16, #tpu.memory_space<vmem>>, vector<64x17xbf16>
    %cst = arith.constant dense<0.000000e+00> : vector<64x256xf32>
    %3 = tpu.matmul %2, %1, %cst {dimension_numbers = #tpu.dot_dimension_numbers<[1], [0], [0], [1], [0, 0, 1, 1], [], []>} : vector<64x17xbf16>, vector<17x256xbf16>, vector<64x256xf32> -> vector<64x256xf32>
    %c0_3 = arith.constant 0 : index
    %c0_4 = arith.constant 0 : index
    %4 = vector.load %arg3[%c0_3, %c0_4] : memref<64x1xf32, #tpu.memory_space<vmem>>, vector<64x1xf32>
    %5 = vector.broadcast %4 : vector<64x1xf32> to vector<64x256xf32>
    %6 = arith.addf %3, %5 : vector<64x256xf32>
    %cst_5 = arith.constant 0.000000e+00 : f32
    %7 = vector.broadcast %cst_5 : f32 to vector<64x256xf32>
    %8 = arith.maximumf %6, %7 : vector<64x256xf32>
    %9 = arith.truncf %8 : vector<64x256xf32> to vector<64x256xbf16>
    %c0_6 = arith.constant 0 : index
    %c0_7 = arith.constant 0 : index
    %10 = vector.load %arg4[%c0_6, %c0_7] : memref<128x64xbf16, #tpu.memory_space<vmem>>, vector<128x64xbf16>
    %cst_8 = arith.constant dense<0.000000e+00> : vector<128x256xf32>
    %11 = tpu.matmul %10, %9, %cst_8 {dimension_numbers = #tpu.dot_dimension_numbers<[1], [0], [0], [1], [0, 0, 1, 1], [], []>} : vector<128x64xbf16>, vector<64x256xbf16>, vector<128x256xf32> -> vector<128x256xf32>
    %c0_9 = arith.constant 0 : index
    %c0_10 = arith.constant 0 : index
    %12 = vector.load %arg5[%c0_9, %c0_10] : memref<128x1xf32, #tpu.memory_space<vmem>>, vector<128x1xf32>
    %13 = vector.broadcast %12 : vector<128x1xf32> to vector<128x256xf32>
    %14 = arith.addf %11, %13 : vector<128x256xf32>
    %cst_11 = arith.constant 0.000000e+00 : f32
    %15 = vector.broadcast %cst_11 : f32 to vector<128x256xf32>
    %16 = arith.maximumf %14, %15 : vector<128x256xf32>
    %17 = arith.truncf %16 : vector<128x256xf32> to vector<128x256xbf16>
    %c0_12 = arith.constant 0 : index
    %c0_13 = arith.constant 0 : index
    %18 = vector.load %arg6[%c0_12, %c0_13] : memref<64x128xbf16, #tpu.memory_space<vmem>>, vector<64x128xbf16>
    %cst_14 = arith.constant dense<0.000000e+00> : vector<64x256xf32>
    %19 = tpu.matmul %18, %17, %cst_14 {dimension_numbers = #tpu.dot_dimension_numbers<[1], [0], [0], [1], [0, 0, 1, 1], [], []>} : vector<64x128xbf16>, vector<128x256xbf16>, vector<64x256xf32> -> vector<64x256xf32>
    %c0_15 = arith.constant 0 : index
    %c0_16 = arith.constant 0 : index
    %20 = vector.load %arg7[%c0_15, %c0_16] : memref<64x1xf32, #tpu.memory_space<vmem>>, vector<64x1xf32>
    %21 = vector.broadcast %20 : vector<64x1xf32> to vector<64x256xf32>
    %22 = arith.addf %19, %21 : vector<64x256xf32>
    %cst_17 = arith.constant 0.000000e+00 : f32
    %23 = vector.broadcast %cst_17 : f32 to vector<64x256xf32>
    %24 = arith.maximumf %22, %23 : vector<64x256xf32>
    %25 = arith.truncf %24 : vector<64x256xf32> to vector<64x256xbf16>
    %c0_18 = arith.constant 0 : index
    %c0_19 = arith.constant 0 : index
    %26 = vector.load %arg8[%c0_18, %c0_19] : memref<1x64xbf16, #tpu.memory_space<vmem>>, vector<1x64xbf16>
    %cst_20 = arith.constant dense<0.000000e+00> : vector<1x256xf32>
    %27 = tpu.matmul %26, %25, %cst_20 {dimension_numbers = #tpu.dot_dimension_numbers<[1], [0], [0], [1], [0, 0, 1, 1], [], []>} : vector<1x64xbf16>, vector<64x256xbf16>, vector<1x256xf32> -> vector<1x256xf32>
    %c0_21 = arith.constant 0 : index
    %c0_22 = arith.constant 0 : index
    %28 = vector.load %arg9[%c0_21, %c0_22] : memref<1x1xf32, #tpu.memory_space<vmem>>, vector<1x1xf32>
    %29 = vector.broadcast %28 : vector<1x1xf32> to vector<1x256xf32>
    %30 = arith.addf %27, %29 : vector<1x256xf32>
    %cst_23 = arith.constant 0.000000e+00 : f32
    %31 = vector.broadcast %cst_23 : f32 to vector<1x256xf32>
    %32 = arith.subf %31, %30 : vector<1x256xf32>
    %33 = math.exp %32 : vector<1x256xf32>
    %cst_24 = arith.constant 1.000000e+00 : f32
    %34 = vector.broadcast %cst_24 : f32 to vector<1x256xf32>
    %35 = arith.addf %34, %33 : vector<1x256xf32>
    %36 = tpu.reciprocal %35 {approx = true} : vector<1x256xf32> -> vector<1x256xf32>
    %c0_25 = arith.constant 0 : index
    %c0_26 = arith.constant 0 : index
    %37 = vector.load %arg10[%c0_25, %c0_26] : memref<1x256xf32, #tpu.memory_space<vmem>>, vector<1x256xf32>
    tpu.vector_store %arg10[%c0_25, %c0_26], %36 {strides = array<i32>} : memref<1x256xf32, #tpu.memory_space<vmem>>, vector<1x256xf32>,
    return
  }
  func.func @transform_0(%arg0: i32) -> (i32, i32) {
    %c0_i32 = arith.constant 0 : i32
    %c0_i32_0 = arith.constant 0 : i32
    return %c0_i32, %arg0 : i32, i32
  }
  func.func @transform_1(%arg0: i32) -> (i32, i32) {
    %c0_i32 = arith.constant 0 : i32
    %c0_i32_0 = arith.constant 0 : i32
    %c0_i32_1 = arith.constant 0 : i32
    return %c0_i32, %c0_i32_0 : i32, i32
  }
  func.func @transform_2(%arg0: i32) -> (i32, i32) {
    %c0_i32 = arith.constant 0 : i32
    %c0_i32_0 = arith.constant 0 : i32
    %c0_i32_1 = arith.constant 0 : i32
    return %c0_i32, %c0_i32_0 : i32, i32
  }
  func.func @transform_3(%arg0: i32) -> (i32, i32) {
    %c0_i32 = arith.constant 0 : i32
    %c0_i32_0 = arith.constant 0 : i32
    %c0_i32_1 = arith.constant 0 : i32
    return %c0_i32, %c0_i32_0 : i32, i32
  }
  func.func @transform_4(%arg0: i32) -> (i32, i32) {
    %c0_i32 = arith.constant 0 : i32
    %c0_i32_0 = arith.constant 0 : i32
    %c0_i32_1 = arith.constant 0 : i32
    return %c0_i32, %c0_i32_0 : i32, i32
  }
  func.func @transform_5(%arg0: i32) -> (i32, i32) {
    %c0_i32 = arith.constant 0 : i32
    %c0_i32_0 = arith.constant 0 : i32
    %c0_i32_1 = arith.constant 0 : i32
    return %c0_i32, %c0_i32_0 : i32, i32
  }
  func.func @transform_6(%arg0: i32) -> (i32, i32) {
    %c0_i32 = arith.constant 0 : i32
    %c0_i32_0 = arith.constant 0 : i32
    %c0_i32_1 = arith.constant 0 : i32
    return %c0_i32, %c0_i32_0 : i32, i32
  }
  func.func @transform_7(%arg0: i32) -> (i32, i32) {
    %c0_i32 = arith.constant 0 : i32
    %c0_i32_0 = arith.constant 0 : i32
    %c0_i32_1 = arith.constant 0 : i32
    return %c0_i32, %c0_i32_0 : i32, i32
  }
  func.func @transform_8(%arg0: i32) -> (i32, i32) {
    %c0_i32 = arith.constant 0 : i32
    %c0_i32_0 = arith.constant 0 : i32
    %c0_i32_1 = arith.constant 0 : i32
    return %c0_i32, %c0_i32_0 : i32, i32
  }
  func.func @transform_9(%arg0: i32) -> (i32, i32) {
    %c0_i32 = arith.constant 0 : i32
    %c0_i32_0 = arith.constant 0 : i32
    return %c0_i32, %arg0 : i32, i32
  }
}

</mosaic_0001>

<bundles_post_ra>
// kernel: tpu_custom_call.1
= control target key start
LH: loop header
LB: loop body
LE: loop exit
PB: predicated region body
PF: predicated region fallthrough
CT: control target
= control target key end

     0   :  { %s1206_s0 = inlined_call_operand.vmem [shape: f32[17,256], index: 0, kind: input, shape index: {}]   ;;  %s1207_s1 = inlined_call_operand.vmem [shape: bf16[64,17], index: 1, kind: input, shape index: {}]   ;;  %s1208_s2 = inlined_call_operand.vmem [shape: f32[64,1], index: 2, kind: input, shape index: {}]   ;;  %s1209_s3 = inlined_call_operand.vmem [shape: bf16[128,64], index: 3, kind: input, shape index: {}]   ;;  %s1210_s4 = inlined_call_operand.vmem [shape: f32[128,1], index: 4, kind: input, shape index: {}]   ;;  %s1211_s5 = inlined_call_operand.vmem [shape: bf16[64,128], index: 5, kind: input, shape index: {}]   ;;  %s1212_s6 = inlined_call_operand.vmem [shape: f32[64,1], index: 6, kind: input, shape index: {}]   ;;  %s1213_s7 = inlined_call_operand.vmem [shape: bf16[1,64], index: 7, kind: input, shape index: {}]   ;;  %s1214_s8 = inlined_call_operand.<no memory space> [shape: f32[1,1], index: 8, kind: input, shape index: {}]   ;;  %s1215_s9 = inlined_call_operand.hbm [shape: f32[1,256], index: 9, kind: output, shape index: {}]  }
   0x1   :  { %v14_v0 = vstv %s1214_s8 }
   0x2   :  { %15 = vst [vmem:[#allocation2] sm:$0x1] %v14_v0 }
   0x3   :  { %v37_v1 = vld [vmem:[%s1206_s0 + $0x8] sm:$0xff]  ;;  %v39_v2 = vld [vmem:[%s1206_s0 + $0x18] sm:$0xff]  ;;  %v36_v3 = vld [vmem:[%s1206_s0] sm:$0xff]  ;;  %vm135_vm0 = vcmask 1040384   ;;  %v940_v7 = vmov 0   ;;  %vm122_vm1 = vcmask 138240  }
   0x4   :  { %v43_v4 = vpack.c.bf16 %v39_v2, %v37_v1  ;;  %v38_v5 = vld [vmem:[%s1206_s0 + $0x10] sm:$0xff]  ;;  %v41_v6 = vld [vmem:[%s1206_s0 + $0x28] sm:$0x1]  ;;  %v137_v8 = vsel %vm135_vm0, 65535, %v940_v7  ;;  %v40_v9 = vld [vmem:[%s1206_s0 + $0x20] sm:$0x1]  ;;  %176 = vmatprep.mubr.bf16.mxu0 %v940_v7  ;;  %890 = vset.pattern.permute.xlu0 %v940_v7 }
   0x5   :  { %v42_v10 = vpack.c.bf16 %v38_v5, %v36_v3  ;;  %v45_v11 = vpack.c.bf16 %v41_v6, %v41_v6  ;;  %v44_v12 = vpack.c.bf16 %v40_v9, %v40_v9  ;;  %891 = vset.pattern.permute.xlu1 %v940_v7  ;;  %450 = vmatprep.mubr.bf16.mxu1 %v940_v7  ;;  %v54_v15 = vld [vmem:[%s1208_s2] sm:$0xff]  ;;  %v56_v16 = vld [vmem:[%s1208_s2 + $0x10] sm:$0xff]  ;;  %v55_v18 = vld [vmem:[%s1208_s2 + $0x8] sm:$0xff] }
   0x6   :  { %144 = vmatprep.subr.bf16.mxu0 %v43_v4  ;;  %v892_v17 = vld [vmem:[%s1207_s1] sm:$0xff]   ;;  %64 = vperm.xlu0 %890, %v54_v15   ;;  %v57_v19 = vld [vmem:[%s1208_s2 + $0x18] sm:$0xff]  ;;  %v59_v21 = vld [vmem:[%s1208_s2 + $0x28] sm:$0xff] }
   0x7   :  { %145 = vmatpush1.bf16.msra.mxu0 %v42_v10  ;;  %v142_v13 = vand.u32 %v137_v8, %v45_v11  ;;  %v139_v14 = vand.u32 %v137_v8, %v44_v12  ;;  %74 = vperm.xlu1 %891, %v56_v16   ;;  %v58_v20 = vld [vmem:[%s1208_s2 + $0x20] sm:$0xff]  ;;  %v893_v22 = vld [vmem:[%s1207_s1 + $0x8] sm:$0xff]   ;;  %v60_v23 = vld [vmem:[%s1208_s2 + $0x30] sm:$0xff] }
   0x8   :  { %v61_v24 = vld [vmem:[%s1208_s2 + $0x38] sm:$0xff]  ;;  %v257_v25 = vld [vmem:[%s1210_s4] sm:$0xff]  ;;  %v258_v26 = vld [vmem:[%s1210_s4 + $0x8] sm:$0xff] }
   0x9   :  { %146 = vmatprep.subr.bf16.mxu0 %v142_v13  ;;  %v894_v27 = vld [vmem:[%s1207_s1 + $0x10] sm:$0xff]   ;;  %v260_v29 = vld [vmem:[%s1210_s4 + $0x18] sm:$0xff] }
   0xa   :  { %69 = vperm.xlu0 %890, %v55_v18   ;;  %v259_v28 = vld [vmem:[%s1210_s4 + $0x10] sm:$0xff] }
   0xb   :  { %147 = vmatpush1.bf16.msra.mxu0 %v139_v14  ;;  %79 = vperm.xlu1 %891, %v57_v19  }
   0xe   :  { %862 = vmatmul.mubr.msk.bf16.vlgmr.msra.gmra.mrb[0].mxu0 %vm122_vm1, %v892_v17  ;;  %84 = vperm.xlu0 %890, %v58_v20  }
   0xf   :  { %186 = vmatprep.mubr.bf16.mxu0 %v940_v7  ;;  %89 = vperm.xlu1 %891, %v59_v21  }
  0x12   :  { %94 = vperm.xlu0 %890, %v60_v23  }
  0x13   :  { %99 = vperm.xlu1 %891, %v61_v24  }
  0x16   :  { %863 = vmatmul.mubr.msk.bf16.gmra.mrb[4].mxu0 %vm122_vm1, %v893_v22  ;;  %275 = vperm.xlu0 %890, %v257_v25  }
  0x17   :  { %196 = vmatprep.mubr.bf16.mxu0 %v940_v7  ;;  %280 = vperm.xlu1 %891, %v258_v26  }
  0x18   :  { %16 = vsyncpa [#allocation4], 0  ;;  %v261_v30 = vld [vmem:[%s1210_s4 + $0x20] sm:$0xff]  ;;  %v262_v31 = vld [vmem:[%s1210_s4 + $0x28] sm:$0xff]  ;;  %vm393_vm2 = vcmask 523264  }
  0x19   :  { %v895_v32 = vld [vmem:[%s1207_s1 + $0x18] sm:$0xff]   ;;  %v263_v33 = vld [vmem:[%s1210_s4 + $0x30] sm:$0xff]  ;;  %v265_v35 = vld [vmem:[%s1210_s4 + $0x40] sm:$0xff] }
  0x1a   :  { %285 = vperm.xlu0 %890, %v259_v28   ;;  %v264_v34 = vld [vmem:[%s1210_s4 + $0x38] sm:$0xff]  ;;  %v266_v36 = vld [vmem:[%s1210_s4 + $0x48] sm:$0xff]  ;;  %v267_v37 = vld [vmem:[%s1210_s4 + $0x50] sm:$0xff] }
  0x1b   :  { %290 = vperm.xlu1 %891, %v260_v29   ;;  %v268_v38 = vld [vmem:[%s1210_s4 + $0x58] sm:$0xff]  ;;  %v269_v39 = vld [vmem:[%s1210_s4 + $0x60] sm:$0xff]  ;;  %v270_v40 = vld [vmem:[%s1210_s4 + $0x68] sm:$0xff] }
  0x1c   :  { %v271_v41 = vld [vmem:[%s1210_s4 + $0x70] sm:$0xff]  ;;  %v272_v42 = vld [vmem:[%s1210_s4 + $0x78] sm:$0xff]  ;;  %v587_v43 = vld [vmem:[%s1212_s6] sm:$0xff] }
  0x1d   :  { %v588_v44 = vld [vmem:[%s1212_s6 + $0x8] sm:$0xff]  ;;  %v589_v45 = vld [vmem:[%s1212_s6 + $0x10] sm:$0xff]  ;;  %v590_v46 = vld [vmem:[%s1212_s6 + $0x18] sm:$0xff] }
  0x1e   :  { %864 = vmatmul.mubr.msk.bf16.gmra.mrb[8].mxu0 %vm122_vm1, %v894_v27  ;;  %295 = vperm.xlu0 %890, %v261_v30   ;;  %v591_v47 = vld [vmem:[%s1212_s6 + $0x20] sm:$0xff]  ;;  %v592_v48 = vld [vmem:[%s1212_s6 + $0x28] sm:$0xff]  ;;  %v593_v49 = vld [vmem:[%s1212_s6 + $0x30] sm:$0xff] }
  0x1f   :  { %206 = vmatprep.mubr.bf16.mxu0 %v940_v7  ;;  %300 = vperm.xlu1 %891, %v262_v31   ;;  %v594_v50 = vld [vmem:[%s1212_s6 + $0x38] sm:$0xff]  ;;  %v757_v51 = vld [vmem:[#allocation2] sm:$0x1] }
  0x22   :  { %305 = vperm.xlu0 %890, %v263_v33  }
  0x23   :  { %310 = vperm.xlu1 %891, %v264_v34  }
  0x26   :  { %865 = vmatmul.mubr.msk.bf16.gmra.mrb[12].mxu0 %vm122_vm1, %v895_v32  ;;  %315 = vperm.xlu0 %890, %v265_v35  }
  0x27   :  { %691 = vmatprep.mubr.bf16.mxu0 %v940_v7  ;;  %320 = vperm.xlu1 %891, %v266_v36  }
  0x2a   :  { %325 = vperm.xlu0 %890, %v267_v37  }
  0x2b   :  { %330 = vperm.xlu1 %891, %v268_v38  }
  0x2e   :  { %335 = vperm.xlu0 %890, %v269_v39  }
  0x2f   :  { %340 = vperm.xlu1 %891, %v270_v40  }
  0x32   :  { %345 = vperm.xlu0 %890, %v271_v41  }
  0x33   :  { %350 = vperm.xlu1 %891, %v272_v42  }
  0x36   :  { %597 = vperm.xlu0 %890, %v587_v43  }
  0x37   :  { %602 = vperm.xlu1 %891, %v588_v44  }
  0x3a   :  { %607 = vperm.xlu0 %890, %v589_v45  }
  0x3b   :  { %612 = vperm.xlu1 %891, %v590_v46  }
  0x3e   :  { %617 = vperm.xlu0 %890, %v591_v47  }
  0x3f   :  { %622 = vperm.xlu1 %891, %v592_v48  }
  0x42   :  { %627 = vperm.xlu0 %890, %v593_v49  }
  0x43   :  { %632 = vperm.xlu1 %891, %v594_v50  }
  0x46   :  { %760 = vperm.xlu0 %890, %v757_v51  }
  0x85   :  { %v65_v52 = vpop.permute.xlu0 %64 }
  0x86   :  { %v75_v61 = vpop.permute.xlu1 %74 }
  0x89   :  { %v70_v56 = vpop.permute.xlu0 %69 }
  0x8a   :  { %v80_v9 = vpop.permute.xlu1 %79 }
  0x8d   :  { %v85_v20 = vpop.permute.xlu0 %84 }
  0x8e   :  { %v90_v25 = vpop.permute.xlu1 %89 }
  0x91   :  { %v95_v36 = vpop.permute.xlu0 %94 }
  0x92   :  { %v100_v41 = vpop.permute.xlu1 %99 }
  0xe1   :  { %v178_v53 = vpop.f32.mrb[0].mxu0 }
  0xe2   :  { %v179_v54 = vadd.f32 %v178_v53, %v65_v52  ;;  %v180_v55 = vpop.f32.mrb[1].mxu0  ;;  %v896_v53 = vld [vmem:[%s1209_s3] sm:$0xff]  }
  0xe3   :  { %v181_v57 = vadd.f32 %v180_v55, %v65_v52  ;;  %v182_v58 = vpop.f32.mrb[2].mxu0  ;;  %v898_v55 = vld [vmem:[%s1209_s3 + $0x10] sm:$0xff]  }
  0xe4   :  { %v183_v59 = vadd.f32 %v182_v58, %v70_v56  ;;  %v184_v60 = vpop.f32.mrb[3].mxu0  ;;  %v217_v63 = vmax.f32 %v179_v54, 0.0  ;;  %v897_v54 = vld [vmem:[%s1209_s3 + $0x8] sm:$0xff]  }
  0xe5   :  { %v185_v62 = vadd.f32 %v184_v60, %v70_v56  ;;  %v218_v1 = vmax.f32 %v181_v57, 0.0  ;;  %v899_v56 = vld [vmem:[%s1209_s3 + $0x18] sm:$0xff]   ;;  %v900_v57 = vld [vmem:[%s1209_s3 + $0x20] sm:$0xff]   ;;  %v901_v58 = vld [vmem:[%s1209_s3 + $0x28] sm:$0xff]  }
  0xe6   :  { %v219_v0 = vmax.f32 %v183_v59, 0.0  ;;  %v902_v59 = vld [vmem:[%s1209_s3 + $0x30] sm:$0xff]   ;;  %v903_v60 = vld [vmem:[%s1209_s3 + $0x38] sm:$0xff]  }
  0xe7   :  { %v220_v2 = vmax.f32 %v185_v62, 0.0 }
  0xe8   :  { %v233_v3 = vpack.c.bf16 %v219_v0, %v217_v63 }
  0xe9   :  { %v188_v4 = vpop.f32.mrb[4].mxu0  ;;  %v234_v5 = vpack.c.bf16 %v220_v2, %v218_v1  ;;  %v281_v1 = vpop.permute.xlu1 %280 }
  0xea   :  { %v189_v6 = vadd.f32 %v188_v4, %v75_v61  ;;  %v190_v8 = vpop.f32.mrb[5].mxu0 }
  0xeb   :  { %v191_v10 = vadd.f32 %v190_v8, %v75_v61  ;;  %v192_v11 = vpop.f32.mrb[6].mxu0  ;;  %418 = vmatprep.subr.bf16.mxu1 %v234_v5  ;;  %v276_v61 = vpop.permute.xlu0 %275 }
  0xec   :  { %v193_v12 = vadd.f32 %v192_v11, %v80_v9  ;;  %v194_v13 = vpop.f32.mrb[7].mxu0  ;;  %419 = vmatpush1.bf16.msra.mxu1 %v233_v3  ;;  %v221_v15 = vmax.f32 %v189_v6, 0.0 }
  0xed   :  { %v195_v14 = vadd.f32 %v194_v13, %v80_v9  ;;  %v222_v17 = vmax.f32 %v191_v10, 0.0 }
  0xee   :  { %v223_v16 = vmax.f32 %v193_v12, 0.0 }
  0xef   :  { %v224_v18 = vmax.f32 %v195_v14, 0.0  ;;  %v286_v13 = vpop.permute.xlu0 %285 }
  0xf0   :  { %v235_v19 = vpack.c.bf16 %v223_v16, %v221_v15 }
  0xf1   :  { %v236_v21 = vpack.c.bf16 %v224_v18, %v222_v17  ;;  %v198_v22 = vpop.f32.mrb[8].mxu0  ;;  %v291_v18 = vpop.permute.xlu1 %290 }
  0xf2   :  { %v199_v23 = vadd.f32 %v198_v22, %v85_v20  ;;  %v200_v24 = vpop.f32.mrb[9].mxu0 }
  0xf3   :  { %v201_v26 = vadd.f32 %v200_v24, %v85_v20  ;;  %v202_v27 = vpop.f32.mrb[10].mxu0  ;;  %420 = vmatprep.subr.bf16.mxu1 %v236_v21 }
  0xf4   :  { %v203_v28 = vadd.f32 %v202_v27, %v90_v25  ;;  %v204_v29 = vpop.f32.mrb[11].mxu0  ;;  %421 = vmatpush1.bf16.msra.mxu1 %v235_v19  ;;  %v225_v31 = vmax.f32 %v199_v23, 0.0 }
  0xf5   :  { %v205_v30 = vadd.f32 %v204_v29, %v90_v25  ;;  %v226_v33 = vmax.f32 %v201_v26, 0.0  ;;  %v296_v29 = vpop.permute.xlu0 %295 }
  0xf6   :  { %v227_v32 = vmax.f32 %v203_v28, 0.0 }
  0xf7   :  { %v228_v34 = vmax.f32 %v205_v30, 0.0 }
  0xf8   :  { %v237_v35 = vpack.c.bf16 %v227_v32, %v225_v31 }
  0xf9   :  { %v238_v37 = vpack.c.bf16 %v228_v34, %v226_v33  ;;  %v208_v38 = vpop.f32.mrb[12].mxu0  ;;  %v301_v34 = vpop.permute.xlu1 %300 }
  0xfa   :  { %v209_v39 = vadd.f32 %v208_v38, %v95_v36  ;;  %v210_v40 = vpop.f32.mrb[13].mxu0 }
  0xfb   :  { %v211_v42 = vadd.f32 %v210_v40, %v95_v36  ;;  %v212_v43 = vpop.f32.mrb[14].mxu0  ;;  %422 = vmatprep.subr.bf16.mxu1 %v238_v37 }
  0xfc   :  { %v213_v44 = vadd.f32 %v212_v43, %v100_v41  ;;  %v214_v45 = vpop.f32.mrb[15].mxu0  ;;  %423 = vmatpush1.bf16.msra.mxu1 %v237_v35  ;;  %v229_v47 = vmax.f32 %v209_v39, 0.0 }
  0xfd   :  { %v215_v46 = vadd.f32 %v214_v45, %v100_v41  ;;  %v230_v49 = vmax.f32 %v211_v42, 0.0  ;;  %v306_v45 = vpop.permute.xlu0 %305 }
  0xfe   :  { %v231_v48 = vmax.f32 %v213_v44, 0.0 }
  0xff   :  { %v232_v50 = vmax.f32 %v215_v46, 0.0 }
 0x100   :  { %v239_v51 = vpack.c.bf16 %v231_v48, %v229_v47 }
 0x101   :  { %v240_v52 = vpack.c.bf16 %v232_v50, %v230_v49  ;;  %v311_v50 = vpop.permute.xlu1 %310 }
 0x103   :  { %424 = vmatprep.subr.bf16.mxu1 %v240_v52 }
 0x104   :  { %425 = vmatpush1.bf16.msra.mxu1 %v239_v51 }
 0x107   :  { %874 = vmatmul.mubr.msk.bf16.vlgmr.msra.gmra.mrb[0].mxu1 %vm393_vm2, %v896_v53 }
 0x108   :  { %460 = vmatprep.mubr.bf16.mxu1 %v940_v7 }
 0x10f   :  { %875 = vmatmul.mubr.msk.bf16.gmra.mrb[4].mxu1 %vm393_vm2, %v897_v54 }
 0x110   :  { %470 = vmatprep.mubr.bf16.mxu1 %v940_v7 }
 0x117   :  { %876 = vmatmul.mubr.msk.bf16.gmra.mrb[8].mxu1 %vm393_vm2, %v898_v55 }
 0x118   :  { %480 = vmatprep.mubr.bf16.mxu1 %v940_v7 }
 0x11f   :  { %877 = vmatmul.mubr.msk.bf16.gmra.mrb[12].mxu1 %vm393_vm2, %v899_v56 }
 0x120   :  { %490 = vmatprep.mubr.bf16.mxu1 %v940_v7 }
 0x127   :  { %878 = vmatmul.mubr.msk.bf16.gmra.mrb[16].mxu1 %vm393_vm2, %v900_v57 }
 0x128   :  { %500 = vmatprep.mubr.bf16.mxu1 %v940_v7 }
 0x12f   :  { %879 = vmatmul.mubr.msk.bf16.gmra.mrb[20].mxu1 %vm393_vm2, %v901_v58 }
 0x130   :  { %510 = vmatprep.mubr.bf16.mxu1 %v940_v7 }
 0x137   :  { %880 = vmatmul.mubr.msk.bf16.gmra.mrb[24].mxu1 %vm393_vm2, %v902_v59 }
 0x138   :  { %520 = vmatprep.mubr.bf16.mxu1 %v940_v7 }
 0x13f   :  { %881 = vmatmul.mubr.msk.bf16.gmra.mrb[28].mxu1 %vm393_vm2, %v903_v60 }
 0x1da   :  { %v452_v62 = vpop.f32.mrb[0].mxu1 }
 0x1db   :  { %v453_v63 = vadd.f32 %v452_v62, %v276_v61  ;;  %v454_v0 = vpop.f32.mrb[1].mxu1 }
 0x1dc   :  { %v455_v2 = vadd.f32 %v454_v0, %v276_v61  ;;  %v456_v3 = vpop.f32.mrb[2].mxu1  ;;  %v316_v61 = vpop.permute.xlu0 %315 }
 0x1dd   :  { %v457_v4 = vadd.f32 %v456_v3, %v281_v1  ;;  %v458_v5 = vpop.f32.mrb[3].mxu1  ;;  %v531_v8 = vmax.f32 %v453_v63, 0.0 }
 0x1de   :  { %v459_v6 = vadd.f32 %v458_v5, %v281_v1  ;;  %v532_v10 = vmax.f32 %v455_v2, 0.0  ;;  %v321_v2 = vpop.permute.xlu1 %320 }
 0x1df   :  { %v533_v9 = vmax.f32 %v457_v4, 0.0 }
 0x1e0   :  { %v534_v11 = vmax.f32 %v459_v6, 0.0 }
 0x1e1   :  { %v563_v12 = vpack.c.bf16 %v533_v9, %v531_v8 }
 0x1e2   :  { %v564_v14 = vpack.c.bf16 %v534_v11, %v532_v10  ;;  %v462_v15 = vpop.f32.mrb[4].mxu1 }
 0x1e3   :  { %v463_v16 = vadd.f32 %v462_v15, %v286_v13  ;;  %v464_v17 = vpop.f32.mrb[5].mxu1 }
 0x1e4   :  { %v465_v19 = vadd.f32 %v464_v17, %v286_v13  ;;  %v466_v20 = vpop.f32.mrb[6].mxu1  ;;  %659 = vmatprep.subr.bf16.mxu0 %v564_v14  ;;  %v326_v14 = vpop.permute.xlu0 %325 }
 0x1e5   :  { %v467_v21 = vadd.f32 %v466_v20, %v291_v18  ;;  %v468_v22 = vpop.f32.mrb[7].mxu1  ;;  %660 = vmatpush1.bf16.msra.mxu0 %v563_v12  ;;  %v535_v24 = vmax.f32 %v463_v16, 0.0 }
 0x1e6   :  { %v469_v23 = vadd.f32 %v468_v22, %v291_v18  ;;  %v536_v26 = vmax.f32 %v465_v19, 0.0  ;;  %v331_v19 = vpop.permute.xlu1 %330 }
 0x1e7   :  { %v537_v25 = vmax.f32 %v467_v21, 0.0 }
 0x1e8   :  { %v538_v27 = vmax.f32 %v469_v23, 0.0 }
 0x1e9   :  { %v565_v28 = vpack.c.bf16 %v537_v25, %v535_v24 }
 0x1ea   :  { %v566_v30 = vpack.c.bf16 %v538_v27, %v536_v26  ;;  %v472_v31 = vpop.f32.mrb[8].mxu1 }
 0x1eb   :  { %v473_v32 = vadd.f32 %v472_v31, %v296_v29  ;;  %v474_v33 = vpop.f32.mrb[9].mxu1 }
 0x1ec   :  { %v475_v35 = vadd.f32 %v474_v33, %v296_v29  ;;  %v476_v36 = vpop.f32.mrb[10].mxu1  ;;  %661 = vmatprep.subr.bf16.mxu0 %v566_v30  ;;  %v336_v30 = vpop.permute.xlu0 %335 }
 0x1ed   :  { %v477_v37 = vadd.f32 %v476_v36, %v301_v34  ;;  %v478_v38 = vpop.f32.mrb[11].mxu1  ;;  %662 = vmatpush1.bf16.msra.mxu0 %v565_v28  ;;  %v539_v40 = vmax.f32 %v473_v32, 0.0 }
 0x1ee   :  { %v479_v39 = vadd.f32 %v478_v38, %v301_v34  ;;  %v540_v42 = vmax.f32 %v475_v35, 0.0  ;;  %v341_v35 = vpop.permute.xlu1 %340 }
 0x1ef   :  { %v541_v41 = vmax.f32 %v477_v37, 0.0 }
 0x1f0   :  { %v542_v43 = vmax.f32 %v479_v39, 0.0 }
 0x1f1   :  { %v567_v44 = vpack.c.bf16 %v541_v41, %v539_v40 }
 0x1f2   :  { %v568_v46 = vpack.c.bf16 %v542_v43, %v540_v42  ;;  %v482_v47 = vpop.f32.mrb[12].mxu1 }
 0x1f3   :  { %v483_v48 = vadd.f32 %v482_v47, %v306_v45  ;;  %v484_v49 = vpop.f32.mrb[13].mxu1 }
 0x1f4   :  { %v485_v51 = vadd.f32 %v484_v49, %v306_v45  ;;  %v486_v52 = vpop.f32.mrb[14].mxu1  ;;  %663 = vmatprep.subr.bf16.mxu0 %v568_v46  ;;  %v346_v46 = vpop.permute.xlu0 %345 }
 0x1f5   :  { %v487_v53 = vadd.f32 %v486_v52, %v311_v50  ;;  %v488_v54 = vpop.f32.mrb[15].mxu1  ;;  %664 = vmatpush1.bf16.msra.mxu0 %v567_v44  ;;  %v543_v56 = vmax.f32 %v483_v48, 0.0 }
 0x1f6   :  { %v489_v55 = vadd.f32 %v488_v54, %v311_v50  ;;  %v544_v58 = vmax.f32 %v485_v51, 0.0  ;;  %v351_v51 = vpop.permute.xlu1 %350 }
 0x1f7   :  { %v545_v57 = vmax.f32 %v487_v53, 0.0 }
 0x1f8   :  { %v546_v59 = vmax.f32 %v489_v55, 0.0 }
 0x1f9   :  { %v569_v60 = vpack.c.bf16 %v545_v57, %v543_v56 }
 0x1fa   :  { %v570_v62 = vpack.c.bf16 %v546_v59, %v544_v58  ;;  %v492_v63 = vpop.f32.mrb[16].mxu1 }
 0x1fb   :  { %v493_v0 = vadd.f32 %v492_v63, %v316_v61  ;;  %v494_v1 = vpop.f32.mrb[17].mxu1  ;;  %v904_v63 = vld [vmem:[%s1211_s5] sm:$0xff]  }
 0x1fc   :  { %v495_v3 = vadd.f32 %v494_v1, %v316_v61  ;;  %v496_v4 = vpop.f32.mrb[18].mxu1  ;;  %665 = vmatprep.subr.bf16.mxu0 %v570_v62  ;;  %v906_v1 = vld [vmem:[%s1211_s5 + $0x10] sm:$0xff]  }
 0x1fd   :  { %v497_v5 = vadd.f32 %v496_v4, %v321_v2  ;;  %v498_v6 = vpop.f32.mrb[19].mxu1  ;;  %666 = vmatpush1.bf16.msra.mxu0 %v569_v60  ;;  %v547_v9 = vmax.f32 %v493_v0, 0.0  ;;  %v905_v0 = vld [vmem:[%s1211_s5 + $0x8] sm:$0xff]  }
 0x1fe   :  { %v499_v8 = vadd.f32 %v498_v6, %v321_v2  ;;  %v548_v11 = vmax.f32 %v495_v3, 0.0  ;;  %v907_v2 = vld [vmem:[%s1211_s5 + $0x18] sm:$0xff]   ;;  %v598_v3 = vpop.permute.xlu0 %597 }
 0x1ff   :  { %v549_v10 = vmax.f32 %v497_v5, 0.0 }
 0x200   :  { %v550_v12 = vmax.f32 %v499_v8, 0.0  ;;  %v603_v8 = vpop.permute.xlu1 %602 }
 0x201   :  { %v571_v13 = vpack.c.bf16 %v549_v10, %v547_v9 }
 0x202   :  { %v572_v15 = vpack.c.bf16 %v550_v12, %v548_v11  ;;  %v502_v16 = vpop.f32.mrb[20].mxu1 }
 0x203   :  { %v503_v17 = vadd.f32 %v502_v16, %v326_v14  ;;  %v504_v18 = vpop.f32.mrb[21].mxu1 }
 0x204   :  { %v505_v20 = vadd.f32 %v504_v18, %v326_v14  ;;  %v506_v21 = vpop.f32.mrb[22].mxu1  ;;  %667 = vmatprep.subr.bf16.mxu0 %v572_v15 }
 0x205   :  { %v507_v22 = vadd.f32 %v506_v21, %v331_v19  ;;  %v508_v23 = vpop.f32.mrb[23].mxu1  ;;  %668 = vmatpush1.bf16.msra.mxu0 %v571_v13  ;;  %v551_v25 = vmax.f32 %v503_v17, 0.0 }
 0x206   :  { %v509_v24 = vadd.f32 %v508_v23, %v331_v19  ;;  %v552_v27 = vmax.f32 %v505_v20, 0.0  ;;  %v608_v19 = vpop.permute.xlu0 %607  ;;  %v613_v23 = vpop.permute.xlu1 %612 }
 0x207   :  { %v553_v26 = vmax.f32 %v507_v22, 0.0 }
 0x208   :  { %v554_v28 = vmax.f32 %v509_v24, 0.0 }
 0x209   :  { %v573_v29 = vpack.c.bf16 %v553_v26, %v551_v25 }
 0x20a   :  { %v574_v31 = vpack.c.bf16 %v554_v28, %v552_v27  ;;  %v512_v32 = vpop.f32.mrb[24].mxu1 }
 0x20b   :  { %v513_v33 = vadd.f32 %v512_v32, %v336_v30  ;;  %v514_v34 = vpop.f32.mrb[25].mxu1 }
 0x20c   :  { %v515_v36 = vadd.f32 %v514_v34, %v336_v30  ;;  %v516_v37 = vpop.f32.mrb[26].mxu1  ;;  %669 = vmatprep.subr.bf16.mxu0 %v574_v31  ;;  %v618_v34 = vpop.permute.xlu0 %617 }
 0x20d   :  { %v517_v38 = vadd.f32 %v516_v37, %v341_v35  ;;  %v518_v39 = vpop.f32.mrb[27].mxu1  ;;  %670 = vmatpush1.bf16.msra.mxu0 %v573_v29  ;;  %v555_v41 = vmax.f32 %v513_v33, 0.0 }
 0x20e   :  { %v519_v40 = vadd.f32 %v518_v39, %v341_v35  ;;  %v556_v43 = vmax.f32 %v515_v36, 0.0  ;;  %v623_v39 = vpop.permute.xlu1 %622 }
 0x20f   :  { %v557_v42 = vmax.f32 %v517_v38, 0.0 }
 0x210   :  { %v558_v44 = vmax.f32 %v519_v40, 0.0 }
 0x211   :  { %v575_v45 = vpack.c.bf16 %v557_v42, %v555_v41 }
 0x212   :  { %v576_v47 = vpack.c.bf16 %v558_v44, %v556_v43  ;;  %v522_v48 = vpop.f32.mrb[28].mxu1 }
 0x213   :  { %v523_v49 = vadd.f32 %v522_v48, %v346_v46  ;;  %v524_v50 = vpop.f32.mrb[29].mxu1 }
 0x214   :  { %v525_v52 = vadd.f32 %v524_v50, %v346_v46  ;;  %v526_v53 = vpop.f32.mrb[30].mxu1  ;;  %671 = vmatprep.subr.bf16.mxu0 %v576_v47  ;;  %v628_v50 = vpop.permute.xlu0 %627 }
 0x215   :  { %v527_v54 = vadd.f32 %v526_v53, %v351_v51  ;;  %v528_v55 = vpop.f32.mrb[31].mxu1  ;;  %672 = vmatpush1.bf16.msra.mxu0 %v575_v45  ;;  %v559_v57 = vmax.f32 %v523_v49, 0.0 }
 0x216   :  { %v529_v56 = vadd.f32 %v528_v55, %v351_v51  ;;  %v560_v59 = vmax.f32 %v525_v52, 0.0  ;;  %v633_v55 = vpop.permute.xlu1 %632 }
 0x217   :  { %v561_v58 = vmax.f32 %v527_v54, 0.0 }
 0x218   :  { %v562_v60 = vmax.f32 %v529_v56, 0.0 }
 0x219   :  { %v577_v61 = vpack.c.bf16 %v561_v58, %v559_v57 }
 0x21a   :  { %v578_v62 = vpack.c.bf16 %v562_v60, %v560_v59 }
 0x21c   :  { %673 = vmatprep.subr.bf16.mxu0 %v578_v62 }
 0x21d   :  { %674 = vmatpush1.bf16.msra.mxu0 %v577_v61 }
 0x220   :  { %692 = vmatmul.mubr.bf16.vlgmr.msra.gmra.mrb[16].mxu0 %v904_v63 }
 0x221   :  { %701 = vmatprep.mubr.bf16.mxu0 %v940_v7 }
 0x228   :  { %702 = vmatmul.mubr.bf16.gmra.mrb[20].mxu0 %v905_v0 }
 0x229   :  { %711 = vmatprep.mubr.bf16.mxu0 %v940_v7 }
 0x230   :  { %712 = vmatmul.mubr.bf16.gmra.mrb[24].mxu0 %v906_v1 }
 0x231   :  { %721 = vmatprep.mubr.bf16.mxu0 %v940_v7 }
 0x238   :  { %722 = vmatmul.mubr.bf16.gmra.mrb[28].mxu0 %v907_v2 }
 0x239   :  { %802 = vmatprep.mubr.bf16.mxu0 %v940_v7 }
 0x2f3   :  { %v693_v4 = vpop.f32.mrb[16].mxu0 }
 0x2f4   :  { %v694_v5 = vadd.f32 %v693_v4, %v598_v3  ;;  %v695_v6 = vpop.f32.mrb[17].mxu0  ;;  %v763_v4 = vlaneseq }
 0x2f5   :  { %v696_v9 = vadd.f32 %v695_v6, %v598_v3  ;;  %v697_v10 = vpop.f32.mrb[18].mxu0  ;;  %v756_v3 = vld [vmem:[%s1213_s7] sm:$0x1]  ;;  %s942_s7 = smov [#allocation3]  }
 0x2f6   :  { %v698_v11 = vadd.f32 %v697_v10, %v603_v8  ;;  %v699_v12 = vpop.f32.mrb[19].mxu0  ;;  %v732_v14 = vmax.f32 %v694_v5, 0.0  ;;  %v764_v5 = vshrl.u32 %v763_v4, 7  ;;  %s850_s18 = sshll.u32 %s942_s7, 4  ;;  %vm841_vm3 = vcmp.lt.s32.totalorder %v763_v4, 256  ;;  %s851_s18 = int_to_ptr.vmem [resolvable:$true] %s850_s18 }
 0x2f7   :  { %v700_v13 = vadd.f32 %v699_v12, %v603_v8  ;;  %v733_v16 = vmax.f32 %v696_v9, 0.0  ;;  %v761_v8 = vpop.permute.xlu0 %760  ;;  %s916_s8 = scalar_lea.vmem %s851_s18, 32  ;;  %p921_p1 = scmp.lt.s32.totalorder %s851_s18, %s851_s18 }
 0x2f8   :  { %v734_v15 = vmax.f32 %v698_v11, 0.0  ;;  %v765_v6 = vsub.s32 0, %v764_v5  ;;  %p917_p0 = scmp.ne.s32.totalorder %s851_s18, %s916_s8  ;;  %p922_p2 = scmp.lt.s32.totalorder %s916_s8, %s916_s8 }
 0x2f9   :  { %v735_v17 = vmax.f32 %v700_v13, 0.0 }
 0x2fa   :  { %v748_v18 = vpack.c.bf16 %v734_v15, %v732_v14  ;;  %v766_v9 = vrot.slane %v761_v8, %v765_v6  ;;  %p923_p3 = por %p922_p2, %p921_p1 }
 0x2fb   :  { %v749_v20 = vpack.c.bf16 %v735_v17, %v733_v16  ;;  %v703_v21 = vpop.f32.mrb[20].mxu0 }
 0x2fc   :  { %v704_v22 = vadd.f32 %v703_v21, %v608_v19  ;;  %v705_v7 = vpop.f32.mrb[21].mxu0  ;;  %p924_p4 = pnand %p923_p3, %p917_p0 }
 0x2fd   :  { %v706_v24 = vadd.f32 %v705_v7, %v608_v19  ;;  %v707_v25 = vpop.f32.mrb[22].mxu0  ;;  %770 = vmatprep.subr.bf16.mxu0 %v749_v20 }
 0x2fe   :  { %v708_v26 = vadd.f32 %v707_v25, %v613_v23  ;;  %v709_v27 = vpop.f32.mrb[23].mxu0  ;;  %771 = vmatpush1.bf16.msra.mxu0 %v748_v18  ;;  %v736_v29 = vmax.f32 %v704_v22, 0.0 }
 0x2ff   :  { %v710_v28 = vadd.f32 %v709_v27, %v613_v23  ;;  %v737_v31 = vmax.f32 %v706_v24, 0.0  ;;  %v941_v23 = vmov 1966171168  }
 0x300   :  { %v738_v30 = vmax.f32 %v708_v26, 0.0  ;;  %v825_v24 = vunpack.c.l.s4 %v941_v23 }
 0x301   :  { %v739_v32 = vmax.f32 %v710_v28, 0.0 }
 0x302   :  { %v750_v33 = vpack.c.bf16 %v738_v30, %v736_v29  ;;  %v826_v25 = vunpack.c.0.s8 %v825_v24 }
 0x303   :  { %v751_v35 = vpack.c.bf16 %v739_v32, %v737_v31  ;;  %v713_v36 = vpop.f32.mrb[24].mxu0 }
 0x304   :  { %v714_v37 = vadd.f32 %v713_v36, %v618_v34  ;;  %v715_v38 = vpop.f32.mrb[25].mxu0  ;;  %v829_v27 = vsub.s32 %v826_v25, %v764_v5 }
 0x305   :  { %v716_v40 = vadd.f32 %v715_v38, %v618_v34  ;;  %v717_v41 = vpop.f32.mrb[26].mxu0  ;;  %772 = vmatprep.subr.bf16.mxu0 %v751_v35 }
 0x306   :  { %v718_v42 = vadd.f32 %v717_v41, %v623_v39  ;;  %v719_v43 = vpop.f32.mrb[27].mxu0  ;;  %773 = vmatpush1.bf16.msra.mxu0 %v750_v33  ;;  %v740_v45 = vmax.f32 %v714_v37, 0.0 }
 0x307   :  { %v720_v44 = vadd.f32 %v719_v43, %v623_v39  ;;  %v741_v47 = vmax.f32 %v716_v40, 0.0 }
 0x308   :  { %v742_v46 = vmax.f32 %v718_v42, 0.0 }
 0x309   :  { %v743_v48 = vmax.f32 %v720_v44, 0.0 }
 0x30a   :  { %v752_v49 = vpack.c.bf16 %v742_v46, %v740_v45 }
 0x30b   :  { %v753_v51 = vpack.c.bf16 %v743_v48, %v741_v47  ;;  %v723_v52 = vpop.f32.mrb[28].mxu0 }
 0x30c   :  { %v724_v53 = vadd.f32 %v723_v52, %v628_v50  ;;  %v725_v54 = vpop.f32.mrb[29].mxu0 }
 0x30d   :  { %v726_v56 = vadd.f32 %v725_v54, %v628_v50  ;;  %v727_v57 = vpop.f32.mrb[30].mxu0  ;;  %774 = vmatprep.subr.bf16.mxu0 %v753_v51 }
 0x30e   :  { %v728_v58 = vadd.f32 %v727_v57, %v633_v55  ;;  %v729_v59 = vpop.f32.mrb[31].mxu0  ;;  %775 = vmatpush1.bf16.msra.mxu0 %v752_v49  ;;  %v744_v61 = vmax.f32 %v724_v53, 0.0 }
 0x30f   :  { %v730_v60 = vadd.f32 %v729_v59, %v633_v55  ;;  %v745_v63 = vmax.f32 %v726_v56, 0.0 }
 0x310   :  { %v746_v62 = vmax.f32 %v728_v58, 0.0 }
 0x311   :  { %v747_v0 = vmax.f32 %v730_v60, 0.0 }
 0x312   :  { %v754_v1 = vpack.c.bf16 %v746_v62, %v744_v61 }
 0x313   :  { %v755_v2 = vpack.c.bf16 %v747_v0, %v745_v63 }
 0x315   :  { %776 = vmatprep.subr.bf16.mxu0 %v755_v2 }
 0x316   :  { %777 = vmatpush1.bf16.msra.mxu0 %v754_v1 }
 0x319   :  { %886 = vmatmul.mubr.msk.bf16.vlgmr.msra.gmra.mrb[32].mxu0 %vm393_vm2, %v756_v3 }
 0x3ec   :  { %v804_v10 = vpop.f32.mrb[32].mxu0 }
 0x3ed   :  { %v805_v11 = vadd.f32 %v804_v10, %v766_v9  ;;  %v806_v12 = vpop.f32.mrb[33].mxu0 }
 0x3ee   :  { %v807_v13 = vadd.f32 %v806_v12, %v766_v9  ;;  %v808_v14 = vpop.f32.mrb[34].mxu0 }
 0x3ef   :  { %v811_v15 = vsub.f32 0.0, %v805_v11  ;;  %v809_v16 = vpop.f32.mrb[35].mxu0 }
 0x3f0   :  { %v812_v17 = vsub.f32 0.0, %v807_v13 }
 0x3f1   :  { %v813_v18 = vmul.f32 1.442695, %v811_v15 }
 0x3f2   :  { %v815_v19 = vmul.f32 1.442695, %v812_v17 }
 0x3f3   :  { %908 = vpow2.f32 %v813_v18 }
 0x3f4   :  { %910 = vpow2.f32 %v815_v19 }
 0x3fd   :  { %v909_v20 = vpop.eup %908 }
 0x3fe   :  { %v911_v21 = vpop.eup %910  ;;  %v817_v22 = vadd.f32 1.0, %v909_v20 }
 0x3ff   :  { %v818_v7 = vadd.f32 1.0, %v911_v21 }
 0x400   :  { %912 = vrcp.f32 %v817_v22 }
 0x401   :  { %914 = vrcp.f32 %v818_v7 }
 0x40a   :  { %v913_v26 = vpop.eup %912 }
 0x40b   :  { %v915_v28 = vpop.eup %914 }
 0x40c   :  { %v823_v29 = vcombine.low %v913_v26, %v915_v28 }
 0x40e   :  { %v830_v30 = vrot.slane %v823_v29, %v829_v27 }
 0x410   :  { %v837_v31 = vrot.slane %v830_v30, %v829_v27 }
 0x412   :  { %843 = vst.msk [vmem:[#allocation3] sm:$0x3] %vm841_vm3, %v837_v31 }
 0x413   :  { %927 = shalt.err (!%p924_p4)
}
 0x414   :  { %s928_s20 = scalar_lea.hbm %s1215_s9, 32 }
 0x415   :  { %p929_p5 = scmp.ne.s32.totalorder %s1215_s9, %s928_s20  ;;  %p932_p6 = scmp.lt.u32.totalorder %s928_s20, %s1215_s9 }
 0x417   :  { %p934_p7 = pnand %p932_p6, %p929_p5 }
 0x419   :  { %937 = shalt.err (!%p934_p7)
}
 0x41a   :  { %853 = dma.vmem_to_hbm [thread:$0]  %s851_s18, 32, %s1215_s9, [#allocation4]  }
 0x41b   :  { %938 = dma.done.wait [#allocation4], 32  }
 0x41c   :  { %939 = vsyncadd [#allocation4], 4294967264 }
 0x41d   :  { %857 = vsyncpa [#allocation4], 1 }

</bundles_post_ra>
